<compile_context>
chip_gen: v7x
topology: tpu7x:2x2x1
jax: 0.10.0
libtpu: 0.0.40
codegen_flags: <defaults>
</compile_context>

<pallas_src>
import functools

import numpy as np

import jax
import jax.numpy as jnp
from jax.experimental import pallas as pl
from jax.experimental.pallas import tpu as pltpu


# ----------------------------------------------------------------------------
# Host side: fold all MovingAvg(kernel_size, stride=1) ops (edge-replication
# padding) plus the final 1/len(kernel_sizes) average into ONE (L, L) matrix.
# Cached and vectorised so repeated eager calls pay nothing.
# ----------------------------------------------------------------------------
@functools.lru_cache(maxsize=None)
def _build_multi_avg_matrix(seq_len, kernel_sizes):
    """Return M (L, L) such that M @ x == mean over kernel_sizes of the
    edge-replicated moving average of an (L, D) series x."""
    m = np.zeros((seq_len, seq_len), np.float32)
    rows = np.arange(seq_len)[:, None]                                  # (L, 1)
    for k in kernel_sizes:
        if k % 2 != 1:
            # Even kernels change the output length in the reference PyTorch
            # code and would break the residual subtraction there as well.
            raise ValueError("kernel sizes must be odd, as in the reference module")
        pad = (k - 1) // 2
        cols = np.clip(rows + np.arange(k)[None, :] - pad, 0, seq_len - 1)  # (L, k)
        np.add.at(m, (np.broadcast_to(rows, cols.shape), cols), 1.0 / k)
    m /= float(len(kernel_sizes))
    return jnp.asarray(m)


# ----------------------------------------------------------------------------
# Pallas kernel: one batch *block* per grid step; everything stays in VMEM.
# ----------------------------------------------------------------------------
def _decomp_multi_kernel(x_ref, avg_ref, sea_ref, mean_ref):
    avg = avg_ref[...]                               # (L, L) fused averaging matrix
    # Static unrolled loop over the batch block: each iteration is one MXU matmul
    # plus a VPU subtract.  Avoids any in-kernel batch/seq transpose relayouts.
    for b in range(x_ref.shape[0]):
        xb = x_ref[b]                                # (L, D)
        mean = jnp.dot(avg, xb, preferred_element_type=jnp.float32)
        mean_ref[b] = mean.astype(mean_ref.dtype)
        sea_ref[b] = (xb.astype(jnp.float32) - mean).astype(sea_ref.dtype)


def _tensorcores_per_chip():
    """2 on v7x (two TensorCores per chip), 1 on v5e/v6e/unknown."""
    try:
        kind = jax.devices()[0].device_kind.lower()
    except Exception:
        return 1
    return 2 if ("v7" in kind or "7x" in kind) else 1


def _choose_batch_block(batch, seq_len, channels, itemsize):
    """Largest batch block: whole batch on 1-TC chips, B/2 on 2-TC chips,
    shrunk (keeping divisibility of B) until the double-buffered working set
    fits a conservative VMEM budget."""
    n_splits = _tensorcores_per_chip()
    bt = batch // n_splits if (n_splits > 1 and batch % n_splits == 0) else batch

    def block_bytes(b):
        # avg double-buffered (f32) + x + 2 outputs, each double-buffered.
        return 2 * 4 * seq_len * seq_len + 2 * 3 * b * seq_len * channels * itemsize

    budget = 48 << 20   # conservative vs v7x's 64 MiB physical VMEM
    while bt > 1 and (block_bytes(bt) > budget or batch % bt != 0):
        bt -= 1
    return bt, block_bytes(bt)


def series_decomp_multi(x, kernel_sizes, *, donate_x=False):
    """SeriesDecompMulti.forward: x (B, L, D) -> (seasonal, moving_mean)."""
    B, L, D = x.shape
    avg = _build_multi_avg_matrix(L, tuple(kernel_sizes))
    itemsize = x.dtype.itemsize
    bt, vmem_bytes = _choose_batch_block(B, L, D, itemsize)
    num_blocks = B // bt

    cost = pl.CostEstimate(
        flops=2 * B * L * L * D,
        bytes_accessed=3 * B * L * D * itemsize + L * L * 4,
        transcendentals=0,
    )
    vmem_limit = None
    if vmem_bytes > (32 << 20):                      # above default scoped limit
        vmem_limit = min(vmem_bytes + (4 << 20), 128 << 20)

    sea, mean = pl.pallas_call(
        _decomp_multi_kernel,
        grid=(num_blocks,),
        in_specs=[
            pl.BlockSpec((bt, L, D), lambda i: (i, 0, 0)),
            pl.BlockSpec((L, L), lambda i: (0, 0)),
        ],
        out_specs=[
            pl.BlockSpec((bt, L, D), lambda i: (i, 0, 0)),
            pl.BlockSpec((bt, L, D), lambda i: (i, 0, 0)),
        ],
        out_shape=[
            jax.ShapeDtypeStruct((B, L, D), x.dtype),
            jax.ShapeDtypeStruct((B, L, D), x.dtype),
        ],
        compiler_params=pltpu.CompilerParams(
            dimension_semantics=("parallel",),
            vmem_limit_bytes=vmem_limit,
        ),
        cost_estimate=cost,
        input_output_aliases=({0: 0} if donate_x else {}),
    )(x, avg)
    return sea, mean


# ----------------------------------------------------------------------------
# Pure-JAX reference (mirrors the PyTorch module op-for-op) for verification.
# ----------------------------------------------------------------------------
def _ref_series_decomp_multi(x, kernel_sizes):
    L = x.shape[1]
    means, seas = [], []
    for k in kernel_sizes:
        pad = (k - 1) // 2
        front = jnp.repeat(x[:, 0:1, :], pad, axis=1)
        back = jnp.repeat(x[:, -1:, :], pad, axis=1)
        xp = jnp.concatenate([front, x, back], axis=1)
        m = sum(xp[:, j:j + L, :] for j in range(k)) / float(k)
        means.append(m)
        seas.append(x - m)
    sea = sum(seas) / float(len(seas))
    mean = sum(means) / float(len(means))
    return sea, mean


if __name__ == "__main__":
    B, L, D = 2, 24, 128              # (batch, seq_len, channels); D=128 -> lane-dense stores
    KERNEL_SIZES = [5, 9, 13]         # odd kernels, as used by the reference module

    key = jax.random.PRNGKey(0)
    x = jax.random.normal(key, (B, L, D), jnp.float32)

    sea, mean = series_decomp_multi(x, KERNEL_SIZES)
    jax.block_until_ready((sea, mean))

    sea_ref, mean_ref = _ref_series_decomp_multi(x, KERNEL_SIZES)
    assert sea.shape == (B, L, D) and mean.shape == (B, L, D)
    np.testing.assert_allclose(np.asarray(mean), np.asarray(mean_ref), rtol=1e-4, atol=1e-4)
    np.testing.assert_allclose(np.asarray(sea), np.asarray(sea_ref), rtol=1e-4, atol=1e-4)

    print("KERNEL_OK")
</pallas_src>

<mosaic_0001>
module attributes {stable_mosaic.version = 11 : i64} {
  func.func @_decomp_multi_kernel(%arg0: i32, %arg1: memref<2x24x128xf32, #tpu.memory_space<vmem>>, %arg2: memref<24x24xf32, #tpu.memory_space<vmem>>, %arg3: memref<2x24x128xf32, #tpu.memory_space<vmem>>, %arg4: memref<2x24x128xf32, #tpu.memory_space<vmem>>) attributes {dimension_semantics = [#tpu.dimension_semantics<parallel>], iteration_bounds = array<i64: 1>, scalar_prefetch = 0 : i64, scratch_operands = 0 : i64, tpu.core_type = #tpu.core_type<tc>, window_params = [{transform_indices = @transform_0, window_bounds = array<i64: 2, 24, 128>}, {pipeline_mode = #tpu.pipeline_mode<synchronous>, transform_indices = @transform_1, window_bounds = array<i64: 24, 24>}, {transform_indices = @transform_2, window_bounds = array<i64: 2, 24, 128>}, {transform_indices = @transform_3, window_bounds = array<i64: 2, 24, 128>}]} {
    %c0 = arith.constant 0 : index
    %c0_0 = arith.constant 0 : index
    %0 = vector.load %arg2[%c0, %c0_0] : memref<24x24xf32, #tpu.memory_space<vmem>>, vector<24x24xf32>
    %c0_1 = arith.constant 0 : index
    %c0_2 = arith.constant 0 : index
    %c0_3 = arith.constant 0 : index
    %1 = vector.load %arg1[%c0_1, %c0_2, %c0_3] : memref<2x24x128xf32, #tpu.memory_space<vmem>>, vector<1x24x128xf32>
    %2 = vector.shape_cast %1 : vector<1x24x128xf32> to vector<24x128xf32>
    %cst = arith.constant dense<0.000000e+00> : vector<24x128xf32>
    %3 = tpu.matmul %0, %2, %cst {dimension_numbers = #tpu.dot_dimension_numbers<[1], [0], [0], [1], [0, 0, 1, 1], [], []>} : vector<24x24xf32>, vector<24x128xf32>, vector<24x128xf32> -> vector<24x128xf32>
    %c0_4 = arith.constant 0 : index
    %c0_5 = arith.constant 0 : index
    %c0_6 = arith.constant 0 : index
    %4 = vector.load %arg4[%c0_4, %c0_5, %c0_6] : memref<2x24x128xf32, #tpu.memory_space<vmem>>, vector<1x24x128xf32>
    %5 = vector.shape_cast %4 : vector<1x24x128xf32> to vector<24x128xf32>
    %6 = vector.shape_cast %3 : vector<24x128xf32> to vector<1x24x128xf32>
    tpu.vector_store %arg4[%c0_4, %c0_5, %c0_6], %6 {strides = array<i32>} : memref<2x24x128xf32, #tpu.memory_space<vmem>>, vector<1x24x128xf32>,
    %7 = arith.subf %2, %3 : vector<24x128xf32>
    %c0_7 = arith.constant 0 : index
    %c0_8 = arith.constant 0 : index
    %c0_9 = arith.constant 0 : index
    %8 = vector.load %arg3[%c0_7, %c0_8, %c0_9] : memref<2x24x128xf32, #tpu.memory_space<vmem>>, vector<1x24x128xf32>
    %9 = vector.shape_cast %8 : vector<1x24x128xf32> to vector<24x128xf32>
    %10 = vector.shape_cast %7 : vector<24x128xf32> to vector<1x24x128xf32>
    tpu.vector_store %arg3[%c0_7, %c0_8, %c0_9], %10 {strides = array<i32>} : memref<2x24x128xf32, #tpu.memory_space<vmem>>, vector<1x24x128xf32>,
    %c1 = arith.constant 1 : index
    %c0_10 = arith.constant 0 : index
    %c0_11 = arith.constant 0 : index
    %11 = vector.load %arg1[%c1, %c0_10, %c0_11] : memref<2x24x128xf32, #tpu.memory_space<vmem>>, vector<1x24x128xf32>
    %12 = vector.shape_cast %11 : vector<1x24x128xf32> to vector<24x128xf32>
    %cst_12 = arith.constant dense<0.000000e+00> : vector<24x128xf32>
    %13 = tpu.matmul %0, %12, %cst_12 {dimension_numbers = #tpu.dot_dimension_numbers<[1], [0], [0], [1], [0, 0, 1, 1], [], []>} : vector<24x24xf32>, vector<24x128xf32>, vector<24x128xf32> -> vector<24x128xf32>
    %c1_13 = arith.constant 1 : index
    %c0_14 = arith.constant 0 : index
    %c0_15 = arith.constant 0 : index
    %14 = vector.load %arg4[%c1_13, %c0_14, %c0_15] : memref<2x24x128xf32, #tpu.memory_space<vmem>>, vector<1x24x128xf32>
    %15 = vector.shape_cast %14 : vector<1x24x128xf32> to vector<24x128xf32>
    %16 = vector.shape_cast %13 : vector<24x128xf32> to vector<1x24x128xf32>
    tpu.vector_store %arg4[%c1_13, %c0_14, %c0_15], %16 {strides = array<i32>} : memref<2x24x128xf32, #tpu.memory_space<vmem>>, vector<1x24x128xf32>,
    %17 = arith.subf %12, %13 : vector<24x128xf32>
    %c1_16 = arith.constant 1 : index
    %c0_17 = arith.constant 0 : index
    %c0_18 = arith.constant 0 : index
    %18 = vector.load %arg3[%c1_16, %c0_17, %c0_18] : memref<2x24x128xf32, #tpu.memory_space<vmem>>, vector<1x24x128xf32>
    %19 = vector.shape_cast %18 : vector<1x24x128xf32> to vector<24x128xf32>
    %20 = vector.shape_cast %17 : vector<24x128xf32> to vector<1x24x128xf32>
    tpu.vector_store %arg3[%c1_16, %c0_17, %c0_18], %20 {strides = array<i32>} : memref<2x24x128xf32, #tpu.memory_space<vmem>>, vector<1x24x128xf32>,
    return
  }
  func.func @transform_0(%arg0: i32) -> (i32, i32, i32) {
    %c0_i32 = arith.constant 0 : i32
    %c0_i32_0 = arith.constant 0 : i32
    %c0_i32_1 = arith.constant 0 : i32
    return %arg0, %c0_i32, %c0_i32_0 : i32, i32, i32
  }
  func.func @transform_1(%arg0: i32) -> (i32, i32) {
    %c0_i32 = arith.constant 0 : i32
    %c0_i32_0 = arith.constant 0 : i32
    %c0_i32_1 = arith.constant 0 : i32
    return %c0_i32, %c0_i32_0 : i32, i32
  }
  func.func @transform_2(%arg0: i32) -> (i32, i32, i32) {
    %c0_i32 = arith.constant 0 : i32
    %c0_i32_0 = arith.constant 0 : i32
    %c0_i32_1 = arith.constant 0 : i32
    return %arg0, %c0_i32, %c0_i32_0 : i32, i32, i32
  }
  func.func @transform_3(%arg0: i32) -> (i32, i32, i32) {
    %c0_i32 = arith.constant 0 : i32
    %c0_i32_0 = arith.constant 0 : i32
    %c0_i32_1 = arith.constant 0 : i32
    return %arg0, %c0_i32, %c0_i32_0 : i32, i32, i32
  }
}

</mosaic_0001>

<bundles_post_ra>
// kernel: tpu_custom_call.1
= control target key start
LH: loop header
LB: loop body
LE: loop exit
PB: predicated region body
PF: predicated region fallthrough
CT: control target
= control target key end

     0   :  { %9 = vsyncpa [#allocation3], 0  ;;  %s542_s0 = inlined_call_operand.hbm [shape: f32[2,24,128], index: 0, kind: input, shape index: {}]   ;;  %s543_s1 = inlined_call_operand.hbm [shape: f32[24,24], index: 1, kind: input, shape index: {}]   ;;  %s544_s2 = inlined_call_operand.hbm [shape: f32[2,24,128], index: 2, kind: output, shape index: {0}]   ;;  %s545_s3 = inlined_call_operand.hbm [shape: f32[2,24,128], index: 3, kind: output, shape index: {1}]  }
   0x1   :  { %10 = vsyncpa [#allocation6], 0 }
   0x2   :  { %11 = vsyncpa [#allocation4], 0 }
   0x3   :  { %12 = vsyncpa [#allocation9], 0  ;;  %s436_s12 = smov [#allocation2]   ;;  %s340_s16 = scalar_lea.hbm %s542_s0, 768 }
   0x4   :  { %s18_s13 = sshll.u32 %s436_s12, 4  ;;  %p341_p0 = scmp.ne.s32.totalorder %s542_s0, %s340_s16  ;;  %s19_s13 = int_to_ptr.vmem [resolvable:$true] %s18_s13 }
   0x5   :  { %p344_p1 = scmp.lt.u32.totalorder %s340_s16, %s542_s0 }
   0x7   :  { %p346_p2 = pnand %p344_p1, %p341_p0 }
   0x9   :  { %349 = shalt.err (!%p346_p2)
}
   0xa   :  { %s350_s21 = scalar_lea.vmem %s19_s13, 768  ;;  %p355_p4 = scmp.lt.s32.totalorder %s19_s13, %s19_s13 }
   0xb   :  { %p351_p3 = scmp.ne.s32.totalorder %s19_s13, %s350_s21  ;;  %p356_p5 = scmp.lt.s32.totalorder %s350_s21, %s350_s21 }
   0xd   :  { %p357_p6 = por %p356_p5, %p355_p4 }
   0xf   :  { %p358_p7 = pnand %p357_p6, %p351_p3 }
  0x11   :  { %361 = shalt.err (!%p358_p7)
}
  0x12   :  { %s437_s22 = smov 128   ;;  %s438_s23 = smov 8  }
  0x13   :  { %24 = dma.hbm_to_vmem [thread:$0]  %s542_s0, 768, %s19_s13, [#allocation3], %s437_s22, %s437_s22, %s438_s23  }
  0x14   :  { %s439_s26 = smov [#allocation5]   ;;  %s362_s30 = scalar_lea.hbm %s543_s1, 384 }
  0x15   :  { %s30_s27 = sshll.u32 %s439_s26, 4  ;;  %p363_p8 = scmp.ne.s32.totalorder %s543_s1, %s362_s30  ;;  %s31_s27 = int_to_ptr.vmem [resolvable:$true] %s30_s27 }
  0x16   :  { %p366_p9 = scmp.lt.u32.totalorder %s362_s30, %s543_s1 }
  0x18   :  { %p368_p10 = pnand %p366_p9, %p363_p8 }
  0x1a   :  { %371 = shalt.err (!%p368_p10)
}
  0x1b   :  { %s372_s8 = scalar_lea.vmem %s31_s27, 384  ;;  %p377_p12 = scmp.lt.s32.totalorder %s31_s27, %s31_s27 }
  0x1c   :  { %p373_p11 = scmp.ne.s32.totalorder %s31_s27, %s372_s8  ;;  %p378_p13 = scmp.lt.s32.totalorder %s372_s8, %s372_s8 }
  0x1e   :  { %p379_p0 = por %p378_p13, %p377_p12 }
  0x20   :  { %p380_p1 = pnand %p379_p0, %p373_p11 }
  0x22   :  { %383 = shalt.err (!%p380_p1)
}
  0x23   :  { %36 = dma.hbm_to_vmem [thread:$0]  %s543_s1, 384, %s31_s27, [#allocation6], %s437_s22, %s437_s22, %s438_s23  }
  0x24   :  { %428 = dma.done.wait [#allocation3], 768  }
  0x25   :  { %429 = vsyncadd [#allocation3], 4294966528 }
  0x26   :  { %430 = dma.done.wait [#allocation6], 384  }
  0x27   :  { %431 = vsyncadd [#allocation6], 4294966912  ;;  %v440_v0 = vmov 0.0|0.0   ;;  %vm441_vm0 = vmmov 0   ;;  %v442_v1 = vmov 0.0   ;;  %v46_v2 = vld [vmem:[#allocation2] sm:$0xff] }
  0x28   :  { %325 = vmatprep.subr.bf16.mxu0 %v440_v0  ;;  %328 = vmatprep.subr.bf16.mxu1 %v440_v0  ;;  %v47_v3 = vld [vmem:[#allocation2 + $0x8] sm:$0xff]  ;;  %v149_v4 = vld [vmem:[#allocation2 + $0x18] sm:$0xff]  ;;  %v150_v6 = vld [vmem:[#allocation2 + $0x20] sm:$0xff]  ;;  %vm49_vm1 = vcmask 195584   ;;  %s443_s1 = smov [#allocation8]   ;;  %s444_s11 = smov [#allocation7]  }
  0x29   :  { %301 = vmatprep.mubr.msk.f32.mxu0 %vm441_vm0, %v442_v1  ;;  %316 = vmatprep.mubr.msk.f32.mxu1 %vm441_vm0, %v442_v1  ;;  %v326_v5 = vpack.c.bf16 %v47_v3, %v46_v2  ;;  %v329_v7 = vpack.c.bf16 %v150_v6, %v149_v4  ;;  %v48_v8 = vld [vmem:[#allocation2 + $0x10] sm:$0xff]  ;;  %v497_v9 = vld [vmem:[#allocation2 + $0x28] sm:$0xff]  ;;  %v44_v11 = vld [vmem:[#allocation5 + $0x8] sm:$0xff]  ;;  %s260_s10 = sshll.u32 %s443_s1, 4  ;;  %s248_s12 = sshll.u32 %s444_s11, 4  ;;  %s261_s10 = int_to_ptr.vmem [resolvable:$true] %s260_s10  ;;  %s505_s12 = int_to_ptr.vmem [resolvable:$true] %s248_s12 }
  0x2a   :  { %v43_v10 = vld [vmem:[#allocation5] sm:$0xff]  ;;  %v45_v12 = vld [vmem:[#allocation5 + $0x10] sm:$0xff]  ;;  %s384_s13 = scalar_lea.vmem %s261_s10, 768  ;;  %p389_p3 = scmp.lt.s32.totalorder %s261_s10, %s261_s10 }
  0x2b   :  { %327 = vmatpush3.bf16.msra.mxu0 %v326_v5  ;;  %330 = vmatpush3.bf16.msra.mxu1 %v329_v7  ;;  %p385_p2 = scmp.ne.s32.totalorder %s261_s10, %s384_s13  ;;  %p390_p4 = scmp.lt.s32.totalorder %s384_s13, %s384_s13 }
  0x2c   :  { %299 = vmatprep.subr.mxu0 %v442_v1  ;;  %314 = vmatprep.subr.mxu1 %v442_v1 }
  0x2d   :  { %p391_p5 = por %p390_p4, %p389_p3 }
  0x2f   :  { %300 = vmatpush3.msra.mxu0 %v48_v8  ;;  %315 = vmatpush3.msra.mxu1 %v497_v9  ;;  %p392_p6 = pnand %p391_p5, %p385_p2 }
  0x30   :  { %302 = vmatmul.mubr.msk.f32.vlgmr.msra.gmra.mrb[0].mxu0 %vm49_vm1, %v43_v10  ;;  %317 = vmatmul.mubr.msk.f32.vlgmr.msra.gmra.mrb[0].mxu1 %vm49_vm1, %v43_v10 }
  0x31   :  { %304 = vmatprep.mubr.msk.f32.mxu0 %vm441_vm0, %v442_v1  ;;  %319 = vmatprep.mubr.msk.f32.mxu1 %vm441_vm0, %v442_v1 }
  0x34   :  { %305 = vmatmul.mubr.msk.f32.gmra.mrb[2].mxu0 %vm49_vm1, %v44_v11  ;;  %320 = vmatmul.mubr.msk.f32.gmra.mrb[2].mxu1 %vm49_vm1, %v44_v11 }
  0x35   :  { %307 = vmatprep.mubr.msk.f32.mxu0 %vm441_vm0, %v442_v1  ;;  %322 = vmatprep.mubr.msk.f32.mxu1 %vm441_vm0, %v442_v1 }
  0x38   :  { %308 = vmatmul.mubr.msk.f32.gmra.mrb[4].mxu0 %vm49_vm1, %v45_v12  ;;  %323 = vmatmul.mubr.msk.f32.gmra.mrb[4].mxu1 %vm49_vm1, %v45_v12 }
 0x103   :  { %v125_v13 = vpop.f32.mrb[0].mxu0  ;;  %v218_v15 = vpop.f32.mrb[0].mxu1 }
 0x104   :  { %139 = vst [vmem:[#allocation8] sm:$0xff] %v125_v13  ;;  %v142_v14 = vsub.f32 %v46_v2, %v125_v13  ;;  %v303_v16 = vpop.f32.mrb[1].mxu0  ;;  %233 = vst [vmem:[#allocation8 + $0x18] sm:$0xff] %v218_v15  ;;  %v236_v17 = vsub.f32 %v149_v4, %v218_v15  ;;  %v318_v18 = vpop.f32.mrb[1].mxu1 }
 0x106   :  { %145 = vst [vmem:[#allocation7] sm:$0xff] %v142_v14  ;;  %240 = vst [vmem:[#allocation7 + $0x18] sm:$0xff] %v236_v17 }
 0x107   :  { %v130_v19 = vpop.f32.mrb[2].mxu0  ;;  %v223_v21 = vpop.f32.mrb[2].mxu1 }
 0x108   :  { %140 = vst [vmem:[#allocation8 + $0x8] sm:$0xff] %v130_v19  ;;  %v143_v20 = vsub.f32 %v47_v3, %v130_v19  ;;  %v306_v22 = vpop.f32.mrb[3].mxu0  ;;  %234 = vst [vmem:[#allocation8 + $0x20] sm:$0xff] %v223_v21  ;;  %v237_v23 = vsub.f32 %v150_v6, %v223_v21  ;;  %v321_v24 = vpop.f32.mrb[3].mxu1 }
 0x10a   :  { %146 = vst [vmem:[#allocation7 + $0x8] sm:$0xff] %v143_v20  ;;  %241 = vst [vmem:[#allocation7 + $0x20] sm:$0xff] %v237_v23 }
 0x10b   :  { %v135_v25 = vpop.f32.mrb[4].mxu0  ;;  %v228_v27 = vpop.f32.mrb[4].mxu1 }
 0x10c   :  { %141 = vst [vmem:[#allocation8 + $0x10] sm:$0xff] %v135_v25  ;;  %v144_v26 = vsub.f32 %v48_v8, %v135_v25  ;;  %v309_v28 = vpop.f32.mrb[5].mxu0  ;;  %235 = vst [vmem:[#allocation8 + $0x28] sm:$0xff] %v228_v27  ;;  %v238_v29 = vsub.f32 %v497_v9, %v228_v27  ;;  %v324_v30 = vpop.f32.mrb[5].mxu1 }
 0x10e   :  { %147 = vst [vmem:[#allocation7 + $0x10] sm:$0xff] %v144_v26 }
 0x10f   :  { %395 = shalt.err (!%p392_p6)
}
 0x110   :  { %s396_s16 = scalar_lea.hbm %s545_s3, 768 }
 0x111   :  { %p397_p7 = scmp.ne.s32.totalorder %s545_s3, %s396_s16  ;;  %p400_p8 = scmp.lt.u32.totalorder %s396_s16, %s545_s3 }
 0x113   :  { %p402_p9 = pnand %p400_p8, %p397_p7 }
 0x115   :  { %405 = shalt.err (!%p402_p9)
}
 0x116   :  { %266 = dma.vmem_to_hbm [thread:$0]  %s261_s10, 768, %s545_s3, [#allocation9], %s437_s22, %s437_s22, %s438_s23   ;;  %242 = vst [vmem:[#allocation7 + $0x28] sm:$0xff] %v238_v29 }
 0x117   :  { %s406_s25 = scalar_lea.vmem %s505_s12, 768  ;;  %p411_p11 = scmp.lt.s32.totalorder %s505_s12, %s505_s12 }
 0x118   :  { %p407_p10 = scmp.ne.s32.totalorder %s505_s12, %s406_s25  ;;  %p412_p12 = scmp.lt.s32.totalorder %s406_s25, %s406_s25 }
 0x11a   :  { %p413_p13 = por %p412_p12, %p411_p11 }
 0x11c   :  { %p414_p0 = pnand %p413_p13, %p407_p10 }
 0x11e   :  { %417 = shalt.err (!%p414_p0)
}
 0x11f   :  { %s418_s28 = scalar_lea.hbm %s544_s2, 768 }
 0x120   :  { %p419_p1 = scmp.ne.s32.totalorder %s544_s2, %s418_s28  ;;  %p422_p2 = scmp.lt.u32.totalorder %s418_s28, %s544_s2 }
 0x122   :  { %p424_p3 = pnand %p422_p2, %p419_p1 }
 0x124   :  { %427 = shalt.err (!%p424_p3)
}
 0x125   :  { %254 = dma.vmem_to_hbm [thread:$0]  %s505_s12, 768, %s544_s2, [#allocation4], %s437_s22, %s437_s22, %s438_s23  }
 0x126   :  { %432 = dma.done.wait [#allocation4], 768  }
 0x127   :  { %433 = vsyncadd [#allocation4], 4294966528 }
 0x128   :  { %434 = dma.done.wait [#allocation9], 768  }
 0x129   :  { %435 = vsyncadd [#allocation9], 4294966528 }
 0x12a   :  { %273 = vsyncpa [#allocation3], 1 }
 0x12b   :  { %274 = vsyncpa [#allocation6], 1 }
 0x12c   :  { %275 = vsyncpa [#allocation4], 1 }
 0x12d   :  { %276 = vsyncpa [#allocation9], 1 }

</bundles_post_ra>
